<compile_context>
chip_gen: v7x
topology: tpu7x:2x2x1
jax: 0.10.0
libtpu: 0.0.40
codegen_flags: <defaults>
</compile_context>

<pallas_src>
import functools

import jax
import jax.numpy as jnp
from jax.experimental import pallas as pl
from jax.experimental.pallas import tpu as pltpu

ALPHA = 0.5
GAMMA = 2.0
IGNORE_INDEX = 255
AUX_WEIGHT = 0.4


def _focal_sum_kernel(logits_ref, tgt_ref, out_ref, *, alpha, gamma, ignore_index, hw):
    """One (batch, pixel-tile) grid step.

    logits_ref: (1, C, T) float  -- classes on sublanes, pixels on lanes
    tgt_ref   : (1, 1, T) int32
    out_ref   : (1, 1, T) f32    -- per-lane partial sums, resident across the tile axis
    """
    t = pl.program_id(1)

    @pl.when(t == 0)
    def _():
        out_ref[...] = jnp.zeros_like(out_ref)

    logits = logits_ref[...].astype(jnp.float32)             # (1, C, T)
    tgt = tgt_ref[...]                                        # (1, 1, T)

    # numerically-stable softmax pieces over the class (sublane) axis
    m = jnp.max(logits, axis=1, keepdims=True)                # (1, 1, T)
    shifted = logits - m                                      # (1, C, T)
    exp_shifted = jnp.exp(shifted)                            # (1, C, T)
    sum_exp = jnp.sum(exp_shifted, axis=1, keepdims=True)     # (1, 1, T)

    # gather the target class via a one-hot compare (no dynamic gather on TPU)
    cls = jax.lax.broadcasted_iota(jnp.int32, logits.shape, 1)
    onehot = (cls == tgt).astype(jnp.float32)                 # (1, C, T)
    tgt_shifted = jnp.sum(shifted * onehot, axis=1, keepdims=True)   # (1, 1, T)
    tgt_exp = jnp.sum(exp_shifted * onehot, axis=1, keepdims=True)   # (1, 1, T)

    ce = jnp.log(sum_exp) - tgt_shifted                       # = -log softmax[target]
    pt = tgt_exp * pl.reciprocal(sum_exp)                     # = p_target (reuses exp tile)
    w = 1.0 - pt
    if gamma == 2.0:
        wg = w * w                                            # VPU mul, avoids pow's log+exp
    elif float(gamma).is_integer() and gamma >= 0:
        wg = jnp.ones_like(w)
        for _ in range(int(gamma)):
            wg = wg * w
    else:
        wg = jnp.power(w, gamma)
    focal = alpha * wg * ce

    # mask ignored pixels and the ragged tail of the last tile (garbage past hw)
    tile = logits.shape[-1]
    pix = t * tile + jax.lax.broadcasted_iota(jnp.int32, tgt.shape, 2)
    valid = (tgt != ignore_index) & (pix < hw)
    out_ref[...] += jnp.where(valid, focal, 0.0)


def _choose_tile_pixels(hw, c, target_block_bytes=2 << 20):
    """Lane-dense pixel tile: multiple of 128, ~target_block_bytes of f32 logits per block."""
    t = (target_block_bytes // (4 * max(int(c), 1))) // 128 * 128
    t = max(t, 128)
    if t >= hw:
        return hw          # single full-width tile (full-dim block is always legal)
    return t


def focal_loss(inputs, targets, *, alpha=ALPHA, gamma=GAMMA, size_average=True,
               ignore_index=IGNORE_INDEX, tile_pixels=None):
    """inputs: (N, C, H, W) float logits; targets: (N, H, W) int class indices."""
    N, C, H, W = inputs.shape
    HW = H * W

    # free reshapes in native NCHW order -- no transpose, no pad, no extra HBM pass
    logits = inputs.reshape(N, C, HW)
    tgt = targets.reshape(N, 1, HW).astype(jnp.int32)

    if tile_pixels is None:
        T = _choose_tile_pixels(HW, C)
    else:
        T = HW if tile_pixels >= HW else int(tile_pixels)
        if T < HW:
            assert T % 128 == 0, "tile_pixels must be a multiple of 128"
    num_tiles = pl.cdiv(HW, T)

    kernel = functools.partial(
        _focal_sum_kernel, alpha=float(alpha), gamma=float(gamma),
        ignore_index=int(ignore_index), hw=HW)

    partial_sums = pl.pallas_call(
        kernel,
        out_shape=jax.ShapeDtypeStruct((N, 1, T), jnp.float32),
        grid_spec=pltpu.PrefetchScalarGridSpec(
            num_scalar_prefetch=0,
            grid=(N, num_tiles),
            in_specs=[
                pl.BlockSpec((1, C, T), lambda n, t: (n, 0, t)),
                pl.BlockSpec((1, 1, T), lambda n, t: (n, 0, t)),
            ],
            out_specs=pl.BlockSpec((1, 1, T), lambda n, t: (n, 0, 0)),
        ),
        compiler_params=pltpu.CompilerParams(
            dimension_semantics=("parallel", "arbitrary")),
    )(logits, tgt)

    total = jnp.sum(partial_sums)          # tiny tree-reduce outside the kernel
    if size_average:
        return total / jnp.float32(N * HW)
    return total


def u3p_loss(preds, targets, *, aux_weight=AUX_WEIGHT, alpha=ALPHA, gamma=GAMMA,
             ignore_index=IGNORE_INDEX):
    """U3PLloss(loss_type='focal').forward: head focal + mean(aux focal) * aux_weight."""
    if not isinstance(preds, dict):
        preds = {"final_pred": preds}
    loss = focal_loss(preds["final_pred"], targets, alpha=alpha, gamma=gamma,
                      ignore_index=ignore_index)
    aux = [focal_loss(preds[k], targets, alpha=alpha, gamma=gamma,
                      ignore_index=ignore_index)
           for k in preds if "aux" in k]
    if aux:
        loss = loss + (sum(aux) / len(aux)) * aux_weight
    return loss


def _reference_focal_loss(inputs, targets, *, alpha=ALPHA, gamma=GAMMA,
                          ignore_index=IGNORE_INDEX):
    # pure-JAX reference of F.cross_entropy(..., reduction='none', ignore_index) + focal
    logp = jax.nn.log_softmax(inputs, axis=1)                 # (N, C, H, W)
    tgt = targets.astype(jnp.int32)
    valid = tgt != ignore_index
    safe_tgt = jnp.where(valid, tgt, 0)
    gathered = jnp.take_along_axis(logp, safe_tgt[:, None, :, :], axis=1)[:, 0]
    ce = jnp.where(valid, -gathered, 0.0)
    pt = jnp.exp(-ce)
    return jnp.mean(alpha * (1.0 - pt) ** gamma * ce)


if __name__ == "__main__":
    key = jax.random.PRNGKey(0)
    k1, k2, k3 = jax.random.split(key, 3)

    N, C, H, W = 2, 4, 16, 16
    final_pred = jax.random.normal(k1, (N, C, H, W), dtype=jnp.float32)
    aux_pred = jax.random.normal(k3, (N, C, H, W), dtype=jnp.float32)
    targets = jax.random.randint(k2, (N, H, W), 0, C, dtype=jnp.int32)
    # sprinkle a few ignore_index pixels to exercise the mask
    targets = targets.at[0, 0, :4].set(IGNORE_INDEX)

    # 1) preds passed as a raw array -> just the head focal loss
    out = jax.block_until_ready(u3p_loss(final_pred, targets))
    ref = _reference_focal_loss(final_pred, targets)
    assert jnp.allclose(out, ref, atol=1e-5, rtol=1e-5), (out, ref)

    # 2) preds dict with one aux head (aux_weight = 0.4)
    out2 = jax.block_until_ready(
        u3p_loss({"final_pred": final_pred, "aux1_pred": aux_pred}, targets))
    ref2 = ref + AUX_WEIGHT * _reference_focal_loss(aux_pred, targets)
    assert jnp.allclose(out2, ref2, atol=1e-5, rtol=1e-5), (out2, ref2)

    # 3) exercise the multi-tile path with a ragged tail (H*W not a multiple of 128)
    H2 = W2 = 20
    p3 = jax.random.normal(k1, (N, C, H2, W2), dtype=jnp.float32)
    t3 = jax.random.randint(k2, (N, H2, W2), 0, C, dtype=jnp.int32)
    t3 = t3.at[1, 3, :5].set(IGNORE_INDEX)
    out3 = jax.block_until_ready(focal_loss(p3, t3, tile_pixels=128))
    ref3 = _reference_focal_loss(p3, t3)
    assert jnp.allclose(out3, ref3, atol=1e-5, rtol=1e-5), (out3, ref3)

    print("KERNEL_OK")
</pallas_src>

<mosaic_0001>
module attributes {stable_mosaic.version = 11 : i64} {
  func.func @_focal_sum_kernel(%arg0: i32, %arg1: i32, %arg2: memref<1x4x256xf32, #tpu.memory_space<vmem>>, %arg3: memref<1x1x256xi32, #tpu.memory_space<vmem>>, %arg4: memref<1x1x256xf32, #tpu.memory_space<vmem>>) attributes {dimension_semantics = [#tpu.dimension_semantics<parallel>, #tpu.dimension_semantics<arbitrary>], iteration_bounds = array<i64: 2, 1>, scalar_prefetch = 0 : i64, scratch_operands = 0 : i64, tpu.core_type = #tpu.core_type<tc>, window_params = [{transform_indices = @transform_0, window_bounds = array<i64: 1, 4, 256>}, {transform_indices = @transform_1, window_bounds = array<i64: 1, 1, 256>}, {transform_indices = @transform_2, window_bounds = array<i64: 1, 1, 256>}]} {
    %c0_i32 = arith.constant 0 : i32
    %0 = arith.cmpi eq, %arg1, %c0_i32 : i32
    %1 = arith.extui %0 : i1 to i32
    %c0_i32_0 = arith.constant 0 : i32
    %2 = arith.cmpi ne, %1, %c0_i32_0 : i32
    scf.if %2 {
      %cst_19 = arith.constant 0.000000e+00 : f32
      %47 = vector.broadcast %cst_19 : f32 to vector<1x1x256xf32>
      %c0_20 = arith.constant 0 : index
      %c0_21 = arith.constant 0 : index
      %c0_22 = arith.constant 0 : index
      %48 = vector.load %arg4[%c0_20, %c0_21, %c0_22] : memref<1x1x256xf32, #tpu.memory_space<vmem>>, vector<1x1x256xf32>
      tpu.vector_store %arg4[%c0_20, %c0_21, %c0_22], %47 {strides = array<i32>} : memref<1x1x256xf32, #tpu.memory_space<vmem>>, vector<1x1x256xf32>,
    } else {
    }
    %c0 = arith.constant 0 : index
    %c0_1 = arith.constant 0 : index
    %c0_2 = arith.constant 0 : index
    %3 = vector.load %arg2[%c0, %c0_1, %c0_2] : memref<1x4x256xf32, #tpu.memory_space<vmem>>, vector<1x4x256xf32>
    %c0_3 = arith.constant 0 : index
    %c0_4 = arith.constant 0 : index
    %c0_5 = arith.constant 0 : index
    %4 = vector.load %arg3[%c0_3, %c0_4, %c0_5] : memref<1x1x256xi32, #tpu.memory_space<vmem>>, vector<1x1x256xi32>
    %cst = arith.constant dense<0xFF800000> : vector<1x256xf32>
    %5 = vector.multi_reduction <maximumf>, %3, %cst [1] : vector<1x4x256xf32> to vector<1x256xf32>
    %6 = vector.shape_cast %5 : vector<1x256xf32> to vector<1x1x256xf32>
    %7 = vector.broadcast %6 : vector<1x1x256xf32> to vector<1x4x256xf32>
    %8 = arith.subf %3, %7 : vector<1x4x256xf32>
    %9 = math.exp %8 : vector<1x4x256xf32>
    %cst_6 = arith.constant dense<0.000000e+00> : vector<1x256xf32>
    %10 = vector.multi_reduction <add>, %9, %cst_6 [1] : vector<1x4x256xf32> to vector<1x256xf32>
    %11 = vector.shape_cast %10 : vector<1x256xf32> to vector<1x1x256xf32>
    %12 = tpu.iota {dimensions = array<i32: 1>} : vector<1x4x256xi32>
    %13 = vector.broadcast %4 : vector<1x1x256xi32> to vector<1x4x256xi32>
    %14 = arith.cmpi eq, %12, %13 : vector<1x4x256xi32>
    %15 = arith.extui %14 : vector<1x4x256xi1> to vector<1x4x256xi32>
    %16 = arith.sitofp %15 : vector<1x4x256xi32> to vector<1x4x256xf32>
    %17 = arith.mulf %8, %16 : vector<1x4x256xf32>
    %cst_7 = arith.constant dense<0.000000e+00> : vector<1x256xf32>
    %18 = vector.multi_reduction <add>, %17, %cst_7 [1] : vector<1x4x256xf32> to vector<1x256xf32>
    %19 = vector.shape_cast %18 : vector<1x256xf32> to vector<1x1x256xf32>
    %20 = arith.mulf %9, %16 : vector<1x4x256xf32>
    %cst_8 = arith.constant dense<0.000000e+00> : vector<1x256xf32>
    %21 = vector.multi_reduction <add>, %20, %cst_8 [1] : vector<1x4x256xf32> to vector<1x256xf32>
    %22 = vector.shape_cast %21 : vector<1x256xf32> to vector<1x1x256xf32>
    %23 = math.log %11 : vector<1x1x256xf32>
    %24 = arith.subf %23, %19 : vector<1x1x256xf32>
    %25 = tpu.reciprocal %11 : vector<1x1x256xf32> -> vector<1x1x256xf32>
    %26 = arith.mulf %22, %25 : vector<1x1x256xf32>
    %cst_9 = arith.constant 1.000000e+00 : f32
    %27 = vector.broadcast %cst_9 : f32 to vector<1x1x256xf32>
    %28 = arith.subf %27, %26 : vector<1x1x256xf32>
    %29 = arith.mulf %28, %28 : vector<1x1x256xf32>
    %cst_10 = arith.constant 5.000000e-01 : f32
    %30 = vector.broadcast %cst_10 : f32 to vector<1x1x256xf32>
    %31 = arith.mulf %30, %29 : vector<1x1x256xf32>
    %32 = arith.mulf %31, %24 : vector<1x1x256xf32>
    %c256_i32 = arith.constant 256 : i32
    %33 = arith.muli %arg1, %c256_i32 : i32
    %34 = tpu.iota {dimensions = array<i32: 2>} : vector<1x1x256xi32>
    %35 = vector.broadcast %33 : i32 to vector<1x1x256xi32>
    %36 = arith.addi %35, %34 : vector<1x1x256xi32>
    %c255_i32 = arith.constant 255 : i32
    %37 = vector.broadcast %c255_i32 : i32 to vector<1x1x256xi32>
    %38 = arith.cmpi ne, %4, %37 : vector<1x1x256xi32>
    %c256_i32_11 = arith.constant 256 : i32
    %39 = vector.broadcast %c256_i32_11 : i32 to vector<1x1x256xi32>
    %40 = arith.cmpi slt, %36, %39 : vector<1x1x256xi32>
    %41 = arith.andi %38, %40 : vector<1x1x256xi1>
    %c0_12 = arith.constant 0 : index
    %c0_13 = arith.constant 0 : index
    %c0_14 = arith.constant 0 : index
    %42 = vector.load %arg4[%c0_12, %c0_13, %c0_14] : memref<1x1x256xf32, #tpu.memory_space<vmem>>, vector<1x1x256xf32>
    %cst_15 = arith.constant 0.000000e+00 : f32
    %43 = vector.broadcast %cst_15 : f32 to vector<1x1x256xf32>
    %44 = arith.select %41, %32, %43 : vector<1x1x256xi1>, vector<1x1x256xf32>
    %45 = arith.addf %42, %44 : vector<1x1x256xf32>
    %c0_16 = arith.constant 0 : index
    %c0_17 = arith.constant 0 : index
    %c0_18 = arith.constant 0 : index
    %46 = vector.load %arg4[%c0_16, %c0_17, %c0_18] : memref<1x1x256xf32, #tpu.memory_space<vmem>>, vector<1x1x256xf32>
    tpu.vector_store %arg4[%c0_16, %c0_17, %c0_18], %45 {strides = array<i32>} : memref<1x1x256xf32, #tpu.memory_space<vmem>>, vector<1x1x256xf32>,
    return
  }
  func.func @transform_0(%arg0: i32, %arg1: i32) -> (i32, i32, i32) {
    %c0_i32 = arith.constant 0 : i32
    %c0_i32_0 = arith.constant 0 : i32
    return %arg0, %c0_i32, %arg1 : i32, i32, i32
  }
  func.func @transform_1(%arg0: i32, %arg1: i32) -> (i32, i32, i32) {
    %c0_i32 = arith.constant 0 : i32
    %c0_i32_0 = arith.constant 0 : i32
    return %arg0, %c0_i32, %arg1 : i32, i32, i32
  }
  func.func @transform_2(%arg0: i32, %arg1: i32) -> (i32, i32, i32) {
    %c0_i32 = arith.constant 0 : i32
    %c0_i32_0 = arith.constant 0 : i32
    %c0_i32_1 = arith.constant 0 : i32
    return %arg0, %c0_i32, %c0_i32_0 : i32, i32, i32
  }
}

</mosaic_0001>

<bundles_post_ra>
// kernel: tpu_custom_call.1
= control target key start
LH: loop header
LB: loop body
LE: loop exit
PB: predicated region body
PF: predicated region fallthrough
CT: control target
= control target key end

     0   :  { %7 = vsyncpa [#allocation3], 0  ;;  %s1047_s0 = inlined_call_operand.hbm [shape: f32[2,4,256], index: 0, kind: input, shape index: {}]   ;;  %s1048_s1 = inlined_call_operand.hbm [shape: s32[2,1,256], index: 1, kind: input, shape index: {}]   ;;  %s1049_s2 = inlined_call_operand.hbm [shape: f32[2,1,256], index: 2, kind: output, shape index: {}]  }
   0x1   :  { %9 = vsyncpa [#allocation3 + $0x1], 0 }
   0x2   :  { %10 = vsyncpa [#allocation6], 0 }
   0x3   :  { %12 = vsyncpa [#allocation6 + $0x1], 0 }
   0x4   :  { %13 = vsyncpa [#allocation4], 0 }
   0x5   :  { %15 = vsyncpa [#allocation4 + $0x1], 0  ;;  %s798_s9 = smov 0   ;;  %s800_s10 = smov 0  }
   0x6   :  { %s802_s11 = smov 0   ;;  %s804_s12 = smov 0  }
   0x7   :  { %s806_s13 = smov 0   ;;  %s808_s14 = smov 0  }
   0x8 LB: > { %s524_s15 = sadd.s32 4294967295, %s775_s14   ;;  %s525_s16 = sadd.s32 4294967294, %s775_s14   ;;  %s775_s14 = sphi %s808_s14, %s21_s14   ;;  %s771_s13 = sphi %s806_s13, %s1071_s13   ;;  %s767_s12 = sphi %s804_s12, %s1070_s12   ;;  %s763_s11 = sphi %s802_s11, %s1069_s11   ;;  %s759_s10 = sphi %s800_s10, %s1068_s10   ;;  %s755_s9 = sphi %s798_s9, %s1067_s9  }
   0x9   : > { %s33_s17 = sadd.s32 1, %s771_s13  ;;  %s42_s18 = sadd.s32 1, %s763_s11 }
   0xa   : > { %p35_p0 = scmp.ge.s32.totalorder %s33_s17, 2  ;;  %p49_p1 = scmp.ne.s32.totalorder %s763_s11, %s759_s10 }
   0xb   : > { %p50_p2 = scmp.eq.s32.totalorder %s775_s14, 0  ;;  %p55_p3 = scmp.ne.s32.totalorder %s759_s10, %s755_s9 }
   0xc   : > { %s1073_s17 = smov (%p35_p0, %s33_s17), 0  ;;  %p56_p5 = scmp.eq.s32.totalorder %s524_s15, 0 }
   0xd   : > { %p839_p4 = por %p50_p2, %p49_p1  ;;  %s37_s20 = ssub.s32 %s771_s13, %s1073_s17 }
   0xe   : > { %p107_p6 = scmp.eq.s32.totalorder %s524_s15, 1  ;;  %p40_p7 = scmp.eq.s32.totalorder %s37_s20, 0 }
   0xf   : > { %p845_p8 = por %p56_p5, %p55_p3  ;;  %p113_p10 = scmp.eq.s32.totalorder %s525_s16, 1 }
  0x10   : > { %p849_p9 = por %p107_p6, %p49_p1  ;;  %p565_p13 = scmp.lt.s32.totalorder %s775_s14, 2 }
  0x11   : > { %s1053_s21 = scalar_select %p845_p8, 1, 0 }
  0x12   : > { %s1054_s22 = scalar_select %p849_p9, 1, 0 }
  0x13   : > { %s854_s23 = scalar_select %p40_p7, %s763_s11, %s42_s18  }
  0x14   : > { %p856_p11 = por %p113_p10, %p55_p3  ;;  %s863_s25 = sand.u32 1, %s763_s11  }
  0x15   : > { %s528_s26 = sshll.u32 %s863_s25, 3  ;;  %s545_s27 = sshll.u32 %s771_s13, 7 }
  0x16   : > { %s1055_s24 = scalar_select %p856_p11, 1, 0 }
  0x17   : > { %s870_s30 = scalar_lea.hbm %s1047_s0, %s545_s27  ;;  %s137_s3 = scalar_lea.vmem [#allocation2], %s528_s26 }
  0x18   : > { %s147_s4 = sshll.u32 %s137_s3, 4  ;;  %p876_p0 = pnand %p565_p13, %p839_p4  ;;  %s872_s4 = int_to_ptr.vmem [resolvable:$true] %s147_s4 }
  0x19   : > { %s134_s6 = scalar_lea.sflag [#allocation3], %s863_s25  ;;  %s629_s7 = scalar_lea.hbm %s870_s30, 128 }
  0x1a   : > { %p630_p3 = scmp.ne.s32.totalorder %s870_s30, %s629_s7  ;;  %p631_p5 = pneg %p876_p0 }
  0x1b   : > { %s634_s16 = scalar_lea.hbm %s1047_s0, 256  ;;  %p635_p4 = scmp.lt.u32.totalorder %s870_s30, %s1047_s0 }
  0x1c   : > { %p632_p6 = pnand %p631_p5, %p630_p3  ;;  %p636_p10 = scmp.lt.u32.totalorder %s634_s16, %s629_s7 }
  0x1d   : > { %p638_p12 = scmp.lt.u32.totalorder %s629_s7, %s870_s30 }
  0x1e   : > { %p633_p7 = pneg %p632_p6  ;;  %p637_p13 = por %p636_p10, %p635_p4 }
  0x20   : > { %p639_p1 = por %p638_p12, %p637_p13 }
  0x22   : > { %p640_p2 = pnand %p639_p1, %p633_p7 }
  0x24   : > { %643 = shalt.err (!%p640_p2)
}
  0x25   : > { %s644_s20 = scalar_lea.vmem %s872_s4, 128  ;;  %s777_s26 = smov [#allocation2]  }
  0x26   : > { %p645_p3 = scmp.ne.s32.totalorder %s872_s4, %s644_s20  ;;  %s649_s27 = sshll.u32 %s777_s26, 4  ;;  %s650_s27 = int_to_ptr.vmem [resolvable:$false] %s649_s27 }
  0x27   : > { %s651_s28 = scalar_lea.vmem %s650_s27, 256  ;;  %p652_p9 = scmp.lt.s32.totalorder %s872_s4, %s650_s27 }
  0x28   : > { %p647_p6 = pnand %p645_p3, %p631_p5  ;;  %p653_p4 = scmp.lt.s32.totalorder %s651_s28, %s644_s20 }
  0x2a   : > { %p648_p11 = pneg %p647_p6  ;;  %p654_p10 = por %p653_p4, %p652_p9 }
  0x2c   : > { %p655_p12 = pnand %p654_p10, %p648_p11 }
  0x2e   : > { %658 = shalt.err (!%p655_p12)
}
  0x2f   : > { %557 = dma.hbm_to_vmem [thread:$0]  (!%p876_p0), %s870_s30, 128, %s872_s4, %s134_s6  }
  0x30   : > { %p1057_p1 = scmp.lt.s32.totalorder %s775_s14, 3  ;;  %p1058_p2 = scmp.ge.s32.totalorder %s775_s14, 1 }
  0x31   : > { %s531_s3 = sshll.u32 %s863_s25, 1  ;;  %s546_s7 = sshll.u32 %s771_s13, 5 }
  0x32   : > { %p912_p7 = pnand %p1058_p2, %p1057_p1  ;;  %s921_s16 = scalar_lea.hbm %s1048_s1, %s546_s7 }
  0x33   : > { %s158_s18 = scalar_lea.vmem [#allocation5], %s531_s3  ;;  %s155_s30 = scalar_lea.sflag [#allocation6], %s863_s25 }
  0x34   : > { %s1059_s29 = scalar_select %p912_p7, 1, 0 }
  0x35   : > { %s168_s19 = sshll.u32 %s158_s18, 4  ;;  %s659_s4 = scalar_lea.hbm %s921_s16, 32  ;;  %s169_s19 = int_to_ptr.vmem [resolvable:$true] %s168_s19 }
  0x36   : > { %p660_p9 = scmp.ne.s32.totalorder %s921_s16, %s659_s4  ;;  %s664_s26 = scalar_lea.hbm %s1048_s1, 64 }
  0x37   : > { %p665_p3 = scmp.lt.u32.totalorder %s921_s16, %s1048_s1  ;;  %p666_p6 = scmp.lt.u32.totalorder %s664_s26, %s659_s4 }
  0x38   : > { %p662_p11 = pnand %p660_p9, %p631_p5  ;;  %p668_p10 = scmp.lt.u32.totalorder %s659_s4, %s921_s16 }
  0x39   : > { %p667_p4 = por %p666_p6, %p665_p3 }
  0x3a   : > { %p663_p13 = pneg %p662_p11 }
  0x3b   : > { %p669_p12 = por %p668_p10, %p667_p4 }
  0x3d   : > { %p670_p1 = pnand %p669_p12, %p663_p13 }
  0x3f   : > { %673 = shalt.err (!%p670_p1)
}
  0x40   : > { %s674_s25 = scalar_lea.vmem %s169_s19, 32  ;;  %s778_s3 = smov [#allocation5]  }
  0x41   : > { %p675_p2 = scmp.ne.s32.totalorder %s169_s19, %s674_s25  ;;  %s679_s7 = sshll.u32 %s778_s3, 4  ;;  %s680_s7 = int_to_ptr.vmem [resolvable:$false] %s679_s7 }
  0x42   : > { %s681_s8 = scalar_lea.vmem %s680_s7, 64  ;;  %p682_p8 = scmp.lt.s32.totalorder %s169_s19, %s680_s7 }
  0x43   : > { %p677_p9 = pnand %p675_p2, %p631_p5  ;;  %p683_p7 = scmp.lt.s32.totalorder %s681_s8, %s674_s25 }
  0x45   : > { %p678_p11 = pneg %p677_p9  ;;  %p684_p3 = por %p683_p7, %p682_p8 }
  0x47   : > { %p685_p6 = pnand %p684_p3, %p678_p11 }
  0x49   : > { %688 = shalt.err (!%p685_p6)
}
  0x4a   : > { %560 = dma.hbm_to_vmem [thread:$0]  (!%p876_p0), %s921_s16, 32, %s169_s19, %s155_s30  }
  0x4b   : > { %p1060_p13 = scmp.ne.s32.totalorder %s1059_s29, 0 }
  0x4c   : > { %s946_s15 = sand.u32 (!%p1060_p13), 1, %s759_s10   ;;  %p1061_p5 = scmp.ne.s32.totalorder (!%p1060_p13), %s1053_s21, 0 }
  0x4d   : > { %177 = sbr.rel (%p1060_p13) target bundleno = 181 (0xb5), region = 28  ;;  %s535_s18 = sshll.u32 (!%p1060_p13), %s946_s15, 3 }
  0x4e   : > { %s180_s4 = scalar_lea.sflag (!%p1060_p13), [#allocation3], %s946_s15  ;;  %s183_s6 = scalar_lea.vmem (!%p1060_p13), [#allocation2], %s535_s18 }
  0x54   : > { %742 = dma.done.wait (%p1061_p5), %s180_s4, 128  }
  0x55   : > { %744 = vsyncadd (%p1061_p5), %s180_s4, 4294967168  ;;  %s536_s5 = sshll.u32 %s946_s15, 1  ;;  %s189_s29 = scalar_lea.sflag [#allocation6], %s946_s15 }
  0x56   : > { %s192_s16 = scalar_lea.vmem [#allocation5], %s536_s5 }
  0x57   : > { %746 = dma.done.wait (%p1061_p5), %s189_s29, 32  }
  0x58   : > { %748 = vsyncadd (%p1061_p5), %s189_s29, 4294967264  ;;  %v224_v0 = vlaneseq  ;;  %s964_s19 = scalar_lea.vmem [#allocation7], %s536_s5  ;;  %v779_v2 = vmov 0.0   ;;  %vm234_vm1 = vcmask 1043456   ;;  %v229_v3 = vld [vmem:[%s183_s6] sm:$0xff]  ;;  %s547_s21 = sshll.u32 %s767_s12, 5 }
  0x59   : > { %v232_v4 = vcombine.high %v229_v3, %v229_v3  ;;  %v235_v5 = vsel %vm234_vm1, %v229_v3, -inf  ;;  %v975_v21 = vld [vmem:[%s192_s16] sm:$0x3]  ;;  %s417_s30 = sshll.u32 %s964_s19, 4  ;;  %s995_s27 = scalar_lea.hbm %s1049_s2, %s547_s21  ;;  %s997_s30 = int_to_ptr.vmem [resolvable:$true] %s417_s30 }
  0x5a   : > { %vm960_vm0 = vcmp.lt.s32.totalorder %v224_v0, 256  ;;  %v236_v6 = vrot.slane %v235_v5, 4  ;;  %v971_v14 = vshrl.u32 %v224_v0, 7  ;;  %vm354_vm4 = vcmp.ne.s32.totalorder %v975_v21, 255  ;;  %s403_s28 = scalar_lea.sflag [#allocation4], %s946_s15  ;;  %s689_s25 = scalar_lea.vmem %s997_s30, 32 }
  0x5b   : > { %228 = vst.msk [vmem:[%s964_s19] sm:$0x3] %vm960_vm0, %v779_v2  ;;  %v242_v7 = vsel %vm234_vm1, %v232_v4, -inf  ;;  %p690_p8 = scmp.ne.s32.totalorder %s997_s30, %s689_s25  ;;  %p1064_p0 = scmp.ne.s32.totalorder %s1054_s22, 0 }
  0x5c   : > { %v237_v8 = vmax.f32 %v235_v5, %v236_v6  ;;  %v243_v9 = vrot.slane %v242_v7, 4  ;;  %v277_v19 = vsub.s32 0, %v971_v14  ;;  %v281_v20 = vsub.s32 1, %v971_v14  ;;  %s782_s12 = smov [#allocation7]  }
  0x5d   : > { %p691_p7 = pnand %p690_p8, %p1064_p0  ;;  %s693_s3 = sshll.u32 %s782_s12, 4  ;;  %s694_s3 = int_to_ptr.vmem [resolvable:$false] %s693_s3 }
  0x5e   : > { %v238_v10 = vrot.slane %v237_v8, 2  ;;  %v244_v11 = vmax.f32 %v242_v7, %v243_v9  ;;  %v278_v24 = vrot.slane %v975_v21, %v277_v19  ;;  %v282_v25 = vrot.slane %v975_v21, %v281_v20  ;;  %s695_s7 = scalar_lea.vmem %s694_s3, 64  ;;  %p696_p10 = scmp.lt.s32.totalorder %s997_s30, %s694_s3 }
  0x5f   : > { %v781_v20 = vmov 1   ;;  %p692_p4 = pneg %p691_p7  ;;  %p697_p12 = scmp.lt.s32.totalorder %s695_s7, %s689_s25 }
  0x60   : > { %v239_v12 = vmax.f32 %v237_v8, %v238_v10  ;;  %v245_v13 = vrot.slane %v244_v11, 2  ;;  %vm283_vm2 = vcmp.eq.s32.totalorder %v971_v14, %v278_v24  ;;  %vm284_vm3 = vcmp.eq.s32.totalorder %v971_v14, %v282_v25 }
  0x61   : > { %v538_v28 = vsel %vm283_vm2, 1.0, %v779_v2  ;;  %v539_v29 = vsel %vm284_vm3, 1.0, %v779_v2  ;;  %v780_v8 = vmov 1966171168   ;;  %p698_p1 = por %p697_p12, %p696_p10 }
  0x62   : > { %v240_v15 = vrot.slane %v239_v12, 1  ;;  %v246_v16 = vmax.f32 %v244_v11, %v245_v13  ;;  %v291_v30 = vcombine.low %v538_v28, %v539_v29  ;;  %v361_v9 = vunpack.c.l.s4 %v780_v8 }
  0x63   : > { %p699_p2 = pnand %p698_p1, %p692_p4 }
  0x64   : > { %v241_v17 = vmax.f32 %v239_v12, %v240_v15  ;;  %v247_v18 = vrot.slane %v246_v16, 1  ;;  %v362_v15 = vunpack.c.0.s8 %v361_v9 }
  0x66   : > { %v248_v22 = vmax.f32 %v246_v16, %v247_v18 }
  0x68   : > { %v251_v23 = vcombine.low %v241_v17, %v248_v22  ;;  %v359_v22 = vcombine.low %v781_v20, %v781_v20 }
  0x6a   : > { %v253_v26 = vsub.f32 %v229_v3, %v251_v23 }
  0x6c   : > { %v254_v27 = vmul.f32 1.442695, %v253_v26  ;;  %v293_v31 = vmul.f32 %v291_v30, %v253_v26 }
  0x6e   : > { %619 = vpow2.f32 %v254_v27  ;;  %v295_v35 = vcombine.high %v293_v31, %v293_v31  ;;  %v297_v39 = vsel %vm234_vm1, %v293_v31, 0.0  ;;  %v365_v27 = vsub.s32 %v362_v15, %v971_v14 }
  0x6f   : > { %v298_v48 = vrot.slane %v297_v39, 4 }
  0x70   : > { %v304_v44 = vsel %vm234_vm1, %v295_v35, 0.0 }
  0x71   : > { %v305_v54 = vrot.slane %v304_v44, 4  ;;  %v299_v58 = vadd.f32 %v298_v48, %v297_v39 }
  0x73   : > { %v306_v62 = vadd.f32 %v305_v54, %v304_v44  ;;  %v300_v2 = vrot.slane %v299_v58, 2 }
  0x75   : > { %v307_v4 = vrot.slane %v306_v62, 2  ;;  %v301_v6 = vadd.f32 %v300_v2, %v299_v58 }
  0x77   : > { %v308_v10 = vadd.f32 %v307_v4, %v306_v62  ;;  %v302_v12 = vrot.slane %v301_v6, 1 }
  0x78   : > { %v620_v32 = vpop.eup %619 }
  0x79   : > { %v257_v33 = vcombine.high %v620_v32, %v620_v32  ;;  %v259_v34 = vsel %vm234_vm1, %v620_v32, 0.0  ;;  %v311_v37 = vmul.f32 %v620_v32, %v291_v30  ;;  %v309_v17 = vrot.slane %v308_v10, 1 }
  0x7a   : > { %v260_v36 = vrot.slane %v259_v34, 4  ;;  %v303_v24 = vadd.f32 %v302_v12, %v301_v6 }
  0x7b   : > { %v266_v38 = vsel %vm234_vm1, %v257_v33, 0.0  ;;  %v313_v42 = vcombine.high %v311_v37, %v311_v37  ;;  %v315_v43 = vsel %vm234_vm1, %v311_v37, 0.0  ;;  %v310_v29 = vadd.f32 %v309_v17, %v308_v10 }
  0x7c   : > { %v261_v40 = vadd.f32 %v260_v36, %v259_v34  ;;  %v267_v41 = vrot.slane %v266_v38, 4  ;;  %v316_v45 = vrot.slane %v315_v43, 4  ;;  %v366_v36 = vrot.slane %v359_v22, %v365_v27 }
  0x7d   : > { %v322_v49 = vsel %vm234_vm1, %v313_v42, 0.0 }
  0x7e   : > { %v262_v46 = vrot.slane %v261_v40, 2  ;;  %v268_v47 = vadd.f32 %v267_v41, %v266_v38  ;;  %v317_v50 = vadd.f32 %v316_v45, %v315_v43  ;;  %v323_v51 = vrot.slane %v322_v49, 4  ;;  %v376_v45 = vld [vmem:[%s964_s19] sm:$0x3] }
  0x7f   : > { %v373_v42 = vrot.slane %v366_v36, %v365_v27 }
  0x80   : > { %v263_v52 = vadd.f32 %v262_v46, %v261_v40  ;;  %v269_v53 = vrot.slane %v268_v47, 2  ;;  %v324_v55 = vadd.f32 %v323_v51, %v322_v49  ;;  %v318_v59 = vrot.slane %v317_v50, 2 }
  0x81   : > { %vm374_vm5 = vcmp.ne.s32.totalorder %v373_v42, 0 }
  0x82   : > { %v264_v56 = vrot.slane %v263_v52, 1  ;;  %v270_v57 = vadd.f32 %v269_v53, %v268_v47  ;;  %v325_v63 = vrot.slane %v324_v55, 2  ;;  %v319_v3 = vadd.f32 %v318_v59, %v317_v50  ;;  %vm375_vm6 = vmand %vm354_vm4, %vm374_vm5 }
  0x84   : > { %v265_v60 = vadd.f32 %v264_v56, %v263_v52  ;;  %v271_v61 = vrot.slane %v270_v57, 1  ;;  %v326_v5 = vadd.f32 %v325_v63, %v324_v55  ;;  %v320_v7 = vrot.slane %v319_v3, 1 }
  0x86   : > { %v272_v0 = vadd.f32 %v271_v61, %v270_v57  ;;  %621 = vlog2.f32 %v265_v60  ;;  %v327_v11 = vrot.slane %v326_v5, 1  ;;  %v321_v13 = vadd.f32 %v320_v7, %v319_v3 }
  0x87   : > { %623 = vrcp.f32 %v265_v60 }
  0x88   : > { %625 = vlog2.f32 %v272_v0  ;;  %v328_v18 = vadd.f32 %v327_v11, %v326_v5 }
  0x89   : > { %627 = vrcp.f32 %v272_v0 }
  0x90   : > { %v622_v16 = vpop.eup %621 }
  0x91   : > { %v624_v19 = vpop.eup %623  ;;  %v330_v25 = vmul.f32 0.6931472, %v622_v16 }
  0x92   : > { %v626_v23 = vpop.eup %625  ;;  %v337_v26 = vmul.f32 %v624_v19, %v321_v13 }
  0x93   : > { %v628_v28 = vpop.eup %627  ;;  %v332_v30 = vmul.f32 0.6931472, %v626_v23  ;;  %v333_v33 = vsub.f32 %v330_v25, %v303_v24 }
  0x94   : > { %v338_v31 = vmul.f32 %v628_v28, %v328_v18  ;;  %v339_v32 = vsub.f32 1.0, %v337_v26 }
  0x95   : > { %v334_v37 = vsub.f32 %v332_v30, %v310_v29 }
  0x96   : > { %v340_v34 = vsub.f32 1.0, %v338_v31  ;;  %v341_v35 = vmul.f32 %v339_v32, %v339_v32 }
  0x98   : > { %v342_v38 = vmul.f32 %v340_v34, %v340_v34  ;;  %v343_v39 = vmul.f32 0.5, %v341_v35 }
  0x9a   : > { %v344_v40 = vmul.f32 0.5, %v342_v38  ;;  %v345_v41 = vmul.f32 %v343_v39, %v333_v33 }
  0x9c   : > { %v346_v14 = vmul.f32 %v344_v40, %v334_v37 }
  0x9e   : > { %v379_v43 = vcombine.low %v345_v41, %v346_v14 }
  0xa0   : > { %v386_v44 = vrot.slane %v379_v43, %v365_v27 }
  0xa2   : > { %v393_v46 = vrot.slane %v386_v44, %v365_v27 }
  0xa4   : > { %v395_v47 = vsel %vm375_vm6, %v393_v46, 0.0 }
  0xa5   : > { %v396_v48 = vadd.f32 %v395_v47, %v376_v45 }
  0xa7   : > { %401 = vst.msk [vmem:[%s964_s19] sm:$0x3] %vm960_vm0, %v396_v48 }
  0xa8   : > { %702 = shalt.err (!%p699_p2)
}
  0xa9   : > { %s703_s8 = scalar_lea.hbm %s995_s27, 32  ;;  %s707_s4 = scalar_lea.hbm %s1049_s2, 64 }
  0xaa   : > { %p704_p9 = scmp.ne.s32.totalorder %s995_s27, %s703_s8  ;;  %p708_p6 = scmp.lt.u32.totalorder %s995_s27, %s1049_s2 }
  0xab   : > { %p709_p13 = scmp.lt.u32.totalorder %s707_s4, %s703_s8  ;;  %p711_p8 = scmp.lt.u32.totalorder %s703_s8, %s995_s27 }
  0xac   : > { %p705_p11 = pnand %p704_p9, %p1064_p0 }
  0xad   : > { %p710_p5 = por %p709_p13, %p708_p6 }
  0xae   : > { %p706_p3 = pneg %p705_p11 }
  0xaf   : > { %p712_p7 = por %p711_p8, %p710_p5 }
  0xb1   : > { %p713_p4 = pnand %p712_p7, %p706_p3 }
  0xb3   : > { %716 = shalt.err (!%p713_p4)
}
  0xb4   : > { %552 = dma.vmem_to_hbm [thread:$0]  (%p1064_p0), %s997_s30, 32, %s995_s27, %s403_s28  }
  0xb5 PF: > { %s429_s29 = sand.u32 1, %s755_s9   ;;  %p1065_p10 = scmp.ne.s32.totalorder %s1055_s24, 0 }
  0xb6   : > { %p1066_p12 = scmp.ge.s32.totalorder %s775_s14, 2  ;;  %s430_s16 = scalar_lea.sflag [#allocation4], %s429_s29 }
  0xb8   : > { %p562_p1 = pnand %p1066_p12, %p1065_p10 }
  0xba   : > { %750 = dma.done.wait (!%p562_p1), %s430_s16, 32  }
  0xbb   : > { %752 = vsyncadd (!%p562_p1), %s430_s16, 4294967264  ;;  %s21_s14 = sadd.s32 1, %s775_s14   ;;  %s1067_s9 = smov %s759_s10 }
  0xbc   : > { %p18_p2 = scmp.ge.s32.totalorder %s21_s14, 4   ;;  %s1068_s10 = smov %s763_s11 }
  0xbd   : > { %s1069_s11 = smov %s854_s23  ;;  %s1070_s12 = smov %s771_s13 }
  0xbe   : > { %s1071_s13 = smov %s1073_s17  ;;  %20 = sbr.rel (!%p18_p2) target bundleno = 8 (0x8), region = 90 }
  0xc5   :  { %435 = vsyncpa [#allocation3], 1 }
  0xc6   :  { %437 = vsyncpa [#allocation3 + $0x1], 1 }
  0xc7   :  { %438 = vsyncpa [#allocation6], 1 }
  0xc8   :  { %440 = vsyncpa [#allocation6 + $0x1], 1 }
  0xc9   :  { %441 = vsyncpa [#allocation4], 1 }
  0xca   :  { %443 = vsyncpa [#allocation4 + $0x1], 1 }

</bundles_post_ra>
